<compile_context>
chip_gen: v5e
topology: v5e:2x2
jax: 0.10.0
libtpu: 0.0.40
codegen_flags: <defaults>
</compile_context>

<pallas_src>
import jax
import jax.numpy as jnp
from jax import lax
from jax.experimental import pallas as pl
from jax.experimental.pallas import tpu as pltpu


# ----------------------------- fused linear projection kernel -----------------------------

def _linear_kernel(x_ref, w_ref, b_ref, o_ref):
    # x: (tm, K) bf16, w: (K, N) bf16 (already transposed from torch's (N, K)),
    # b: (1, N) f32; bf16 MXU operands with f32 accumulation.
    acc = jnp.dot(x_ref[...], w_ref[...], preferred_element_type=jnp.float32)
    o_ref[...] = (acc + b_ref[...]).astype(o_ref.dtype)


def linear_pallas(x, w_t, b, out_dtype=jnp.bfloat16, tile_m=512):
    """y = x @ w_t + b, tiled over rows; weights/bias stay resident in VMEM."""
    M, K = x.shape
    N = w_t.shape[1]
    tm = min(tile_m, M)
    return pl.pallas_call(
        _linear_kernel,
        out_shape=jax.ShapeDtypeStruct((M, N), out_dtype),
        grid=(pl.cdiv(M, tm),),
        in_specs=[
            pl.BlockSpec((tm, K), lambda i: (i, 0)),
            pl.BlockSpec((K, N), lambda i: (0, 0)),   # resident weights
            pl.BlockSpec((1, N), lambda i: (0, 0)),   # resident bias
        ],
        out_specs=pl.BlockSpec((tm, N), lambda i: (i, 0)),
        compiler_params=pltpu.CompilerParams(dimension_semantics=("parallel",)),
    )(x, w_t, b.reshape(1, N))


# ----------------------------- fused global-attention kernel -----------------------------

def _global_attn_kernel(qkv_ref, idx_ref, table_ref, bk_ref, bv_ref, o_ref):
    # One batch element per grid step; all heads processed here so the output
    # is a single lane-dense (n, c) slab (no masked narrow stores).
    _, n, three_c = qkv_ref.shape
    c = three_c // 3
    t_size, h = table_ref.shape
    c_ = c // h

    # Positional bias for all heads at once: one-hot (n, n, T) @ table (T, h)
    # as a batched MXU matmul.  Only pe_idx (int8) and the tiny (T, h) table
    # reach HBM/VMEM; no (B, H, N, N) bias is ever materialized.
    idx = idx_ref[0].astype(jnp.int32)                                    # (n, n)
    iota_t = lax.broadcasted_iota(jnp.int32, (n, n, t_size), 2)
    one_hot = (idx[:, :, None] == iota_t).astype(jnp.bfloat16)            # (n, n, T)
    table_b = jnp.broadcast_to(table_ref[...][None], (n, t_size, h))      # (n, T, h) bf16
    pos_all = lax.dot_general(
        one_hot, table_b,
        dimension_numbers=(((2,), (1,)), ((0,), (0,))),
        preferred_element_type=jnp.float32)                               # (n, n, h) f32

    bk = bk_ref[...]                                                      # (h, c_) f32
    bv = bv_ref[...]                                                      # (h, c_) f32

    outs = []
    for hh in range(h):
        # Per-head slices straight out of the fused qkv slab (torch layout:
        # q heads first, then kv interleaved as [h0_k, h0_v, h1_k, h1_v, ...]).
        q_h = qkv_ref[0, :, hh * c_:(hh + 1) * c_]                        # (n, c_) bf16
        k_h = qkv_ref[0, :, c + (2 * hh) * c_:c + (2 * hh + 1) * c_]      # (n, c_) bf16
        v_h = qkv_ref[0, :, c + (2 * hh + 1) * c_:c + (2 * hh + 2) * c_]  # (n, c_) bf16

        # scores = q @ k^T + pos_embed (head-dim scale already folded into W_q)
        s = lax.dot_general(q_h, k_h, (((1,), (1,)), ((), ())),
                            preferred_element_type=jnp.float32)
        s = s + pos_all[:, :, hh]                                         # (n, n) f32

        bk_h = bk[hh:hh + 1, :]                                           # (1, c_)
        bv_h = bv[hh:hh + 1, :]                                           # (1, c_)

        # "blank" logit; joint softmax over [scores, blank]; stats in f32.
        blank = jnp.sum(q_h.astype(jnp.float32) * bk_h, axis=-1, keepdims=True)
        m = jnp.maximum(jnp.max(s, axis=-1, keepdims=True), blank)
        ea = jnp.exp(s - m)                                               # (n, n) f32
        eb = jnp.exp(blank - m)                                           # (n, 1) f32
        inv = pl.reciprocal(jnp.sum(ea, axis=-1, keepdims=True) + eb, approx=True)

        # Normalize after the matmul; exp-weights cast to bf16 for the MXU.
        out_h = (jnp.dot(ea.astype(jnp.bfloat16), v_h,
                         preferred_element_type=jnp.float32) + eb * bv_h) * inv

        if c_ >= 128:
            # Lane-dense direct store; nothing held live across heads.
            o_ref[0, :, hh * c_:(hh + 1) * c_] = out_h.astype(o_ref.dtype)
        else:
            outs.append(out_h)

    if c_ < 128:
        # c_ below one lane tile: keep the concat so the store stays lane-dense.
        o_ref[0] = jnp.concatenate(outs, axis=-1).astype(o_ref.dtype)


# ----------------------------- module wrapper -----------------------------

def init_params(key, dim, num_heads, pos_dim=2, table_size=49):
    """Deterministic synthetic parameters matching the torch module shapes."""
    ks = jax.random.split(key, 12)

    def lin(kw, kb, n_in, n_out):
        w = jax.random.normal(kw, (n_out, n_in), jnp.float32) * 0.02  # torch layout
        b = jax.random.normal(kb, (n_out,), jnp.float32) * 0.02
        return w.T, b  # store transposed (in, out) for the kernel

    q_w, q_b = lin(ks[0], ks[1], dim, dim)
    kv_w, kv_b = lin(ks[2], ks[3], dim, 2 * dim)
    proj_w, proj_b = lin(ks[4], ks[5], dim, dim)
    pe_w, pe_b = lin(ks[6], ks[7], pos_dim + 3, num_heads)
    blank_k = jax.random.normal(ks[8], (dim,), jnp.float32)
    blank_v = jax.random.normal(ks[9], (dim,), jnp.float32)
    pre_table = jax.random.normal(ks[10], (table_size, pos_dim + 3), jnp.float32)
    return dict(q_w=q_w, q_b=q_b, kv_w=kv_w, kv_b=kv_b,
                proj_w=proj_w, proj_b=proj_b,
                pe_w=pe_w, pe_b=pe_b,
                blank_k=blank_k, blank_v=blank_v,
                pre_table=pre_table)


def cluster_attention(feat, member_idx, cluster_mask, pe_idx, global_attn,
                      params, num_heads):
    """Pallas implementation of ClusterAttention.forward (global_attn=True)."""
    if not global_attn:
        # TODO(synk): clustered local-attention branch (CLUSTENQK/AV gathers)
        raise NotImplementedError("only the global-attention branch is implemented")

    b, n, c = feat.shape
    h = num_heads
    assert c % h == 0, "dim must be divisible by num_heads"
    c_ = c // h
    scale = c_ ** (-0.5)

    # Fused q/kv projection (single HBM read of the activations); the head-dim
    # scale is folded into the q weights/bias; bf16 MXU operands.
    w_qkv = jnp.concatenate([params["q_w"] * scale, params["kv_w"]],
                            axis=1).astype(jnp.bfloat16)                 # (c, 3c)
    b_qkv = jnp.concatenate([params["q_b"] * scale, params["kv_b"]], axis=0)  # (3c,) f32

    x2 = feat.reshape(b * n, c).astype(jnp.bfloat16)
    qkv = linear_pallas(x2, w_qkv, b_qkv, out_dtype=jnp.bfloat16)        # (b*n, 3c)
    qkv = qkv.reshape(b, n, 3 * c)                                       # free reshape

    # tiny (T, pos_dim+3) @ (pos_dim+3, h) table -> (T, h); resident in VMEM (bf16).
    pe_table = (params["pre_table"] @ params["pe_w"] + params["pe_b"]).astype(jnp.bfloat16)
    t_size = pe_table.shape[0]

    # pe_idx is the largest attention-side input (n^2 per batch): ship as int8.
    idx8 = pe_idx.astype(jnp.int8)

    bk = params["blank_k"].reshape(h, c_)
    bv = params["blank_v"].reshape(h, c_)

    attn_out = pl.pallas_call(
        _global_attn_kernel,
        out_shape=jax.ShapeDtypeStruct((b, n, c), jnp.bfloat16),
        grid=(b,),
        in_specs=[
            pl.BlockSpec((1, n, 3 * c), lambda bi: (bi, 0, 0)),   # fused qkv (bf16)
            pl.BlockSpec((1, n, n), lambda bi: (bi, 0, 0)),       # pe_idx (int8)
            pl.BlockSpec((t_size, h), lambda bi: (0, 0)),         # pe_table (bf16, resident)
            pl.BlockSpec((h, c_), lambda bi: (0, 0)),             # blank_k (f32, resident)
            pl.BlockSpec((h, c_), lambda bi: (0, 0)),             # blank_v (f32, resident)
        ],
        out_specs=pl.BlockSpec((1, n, c), lambda bi: (bi, 0, 0)),
        compiler_params=pltpu.CompilerParams(
            dimension_semantics=("parallel",)),                   # batch axis -> both TCs
    )(qkv, idx8, pe_table, bk, bv)

    # Final projection (attn_drop / proj_drop are eval-mode identities).
    out = linear_pallas(attn_out.reshape(b * n, c),
                        params["proj_w"].astype(jnp.bfloat16),
                        params["proj_b"], out_dtype=jnp.float32)
    return out.reshape(b, n, c)


# ----------------------------- pure-JAX reference -----------------------------

def cluster_attention_ref(feat, pe_idx, params, num_heads):
    b, n, c = feat.shape
    h = num_heads
    c_ = c // h
    scale = c_ ** (-0.5)
    q = (feat.reshape(b * n, c) @ params["q_w"] + params["q_b"]) * scale
    kv = feat.reshape(b * n, c) @ params["kv_w"] + params["kv_b"]
    q = q.reshape(b, n, h, c_).transpose(0, 2, 1, 3)
    kv = kv.reshape(b, n, h, 2, c_).transpose(3, 0, 2, 1, 4)
    key, v = kv[0], kv[1]
    attn = jnp.einsum("bhqc,bhkc->bhqk", q, key)
    pe_table = params["pre_table"] @ params["pe_w"] + params["pe_b"]
    pos_embed = jnp.take(pe_table, pe_idx.reshape(-1), axis=0)
    pos_embed = pos_embed.reshape(b, n, n, h).transpose(0, 3, 1, 2)
    attn = attn + pos_embed
    blank_attn = jnp.sum(q * params["blank_k"].reshape(1, h, 1, c_),
                         axis=-1, keepdims=True)
    full = jnp.concatenate([attn, blank_attn], axis=-1)
    full = jax.nn.softmax(full, axis=-1)
    blank_p = full[..., -1:]
    p = full[..., :-1]
    blank_v = blank_p * params["blank_v"].reshape(1, h, 1, c_)
    out = jnp.einsum("bhqk,bhkc->bhqc", p, v) + blank_v
    out = out.transpose(0, 2, 1, 3).reshape(b * n, c)
    out = out @ params["proj_w"] + params["proj_b"]
    return out.reshape(b, n, c)


# ----------------------------- main -----------------------------

if __name__ == "__main__":
    B, N, DIM, HEADS = 2, 16, 32, 4
    TABLE = 49

    key = jax.random.PRNGKey(0)
    k_feat, k_idx, k_param = jax.random.split(key, 3)

    feat = jax.random.normal(k_feat, (B, N, DIM), jnp.float32)
    pe_idx = jax.random.randint(k_idx, (B, N, N), 0, TABLE, jnp.int32)
    params = init_params(k_param, DIM, HEADS, table_size=TABLE)

    # member_idx / cluster_mask are unused in the global-attention branch
    member_idx = jnp.zeros((B, N, 4), jnp.int32)
    cluster_mask = jnp.ones((B, N, 4), jnp.float32)

    out = cluster_attention(feat, member_idx, cluster_mask, pe_idx,
                            global_attn=True, params=params, num_heads=HEADS)
    out = jax.block_until_ready(out)

    ref = cluster_attention_ref(feat, pe_idx, params, HEADS)
    assert out.shape == (B, N, DIM)
    max_err = float(jnp.max(jnp.abs(out - ref)))
    assert jnp.allclose(out, ref, rtol=2e-2, atol=2e-2), \
        f"mismatch vs reference (max abs err {max_err})"

    print("KERNEL_OK")
</pallas_src>

<mosaic_0001>
module attributes {stable_mosaic.version = 11 : i64} {
  func.func @_linear_kernel(%arg0: i32, %arg1: memref<32x32xbf16, #tpu.memory_space<vmem>>, %arg2: memref<32x96xbf16, #tpu.memory_space<vmem>>, %arg3: memref<1x96xf32, #tpu.memory_space<vmem>>, %arg4: memref<32x96xbf16, #tpu.memory_space<vmem>>) attributes {dimension_semantics = [#tpu.dimension_semantics<parallel>], iteration_bounds = array<i64: 1>, scalar_prefetch = 0 : i64, scratch_operands = 0 : i64, tpu.core_type = #tpu.core_type<tc>, window_params = [{transform_indices = @transform_0, window_bounds = array<i64: 32, 32>}, {pipeline_mode = #tpu.pipeline_mode<synchronous>, transform_indices = @transform_1, window_bounds = array<i64: 32, 96>}, {pipeline_mode = #tpu.pipeline_mode<synchronous>, transform_indices = @transform_2, window_bounds = array<i64: 1, 96>}, {transform_indices = @transform_3, window_bounds = array<i64: 32, 96>}]} {
    %c0 = arith.constant 0 : index
    %c0_0 = arith.constant 0 : index
    %0 = vector.load %arg1[%c0, %c0_0] : memref<32x32xbf16, #tpu.memory_space<vmem>>, vector<32x32xbf16>
    %c0_1 = arith.constant 0 : index
    %c0_2 = arith.constant 0 : index
    %1 = vector.load %arg2[%c0_1, %c0_2] : memref<32x96xbf16, #tpu.memory_space<vmem>>, vector<32x96xbf16>
    %cst = arith.constant dense<0.000000e+00> : vector<32x96xf32>
    %2 = tpu.matmul %0, %1, %cst {dimension_numbers = #tpu.dot_dimension_numbers<[1], [0], [0], [1], [0, 0, 1, 1], [], []>} : vector<32x32xbf16>, vector<32x96xbf16>, vector<32x96xf32> -> vector<32x96xf32>
    %c0_3 = arith.constant 0 : index
    %c0_4 = arith.constant 0 : index
    %3 = vector.load %arg3[%c0_3, %c0_4] : memref<1x96xf32, #tpu.memory_space<vmem>>, vector<1x96xf32>
    %4 = vector.broadcast %3 : vector<1x96xf32> to vector<32x96xf32>
    %5 = arith.addf %2, %4 : vector<32x96xf32>
    %6 = arith.truncf %5 : vector<32x96xf32> to vector<32x96xbf16>
    %c0_5 = arith.constant 0 : index
    %c0_6 = arith.constant 0 : index
    %7 = vector.load %arg4[%c0_5, %c0_6] : memref<32x96xbf16, #tpu.memory_space<vmem>>, vector<32x96xbf16>
    tpu.vector_store %arg4[%c0_5, %c0_6], %6 {strides = array<i32>} : memref<32x96xbf16, #tpu.memory_space<vmem>>, vector<32x96xbf16>,
    return
  }
  func.func @transform_0(%arg0: i32) -> (i32, i32) {
    %c0_i32 = arith.constant 0 : i32
    %c0_i32_0 = arith.constant 0 : i32
    return %arg0, %c0_i32 : i32, i32
  }
  func.func @transform_1(%arg0: i32) -> (i32, i32) {
    %c0_i32 = arith.constant 0 : i32
    %c0_i32_0 = arith.constant 0 : i32
    %c0_i32_1 = arith.constant 0 : i32
    return %c0_i32, %c0_i32_0 : i32, i32
  }
  func.func @transform_2(%arg0: i32) -> (i32, i32) {
    %c0_i32 = arith.constant 0 : i32
    %c0_i32_0 = arith.constant 0 : i32
    %c0_i32_1 = arith.constant 0 : i32
    return %c0_i32, %c0_i32_0 : i32, i32
  }
  func.func @transform_3(%arg0: i32) -> (i32, i32) {
    %c0_i32 = arith.constant 0 : i32
    %c0_i32_0 = arith.constant 0 : i32
    return %arg0, %c0_i32 : i32, i32
  }
}

</mosaic_0001>

<bundles_post_ra>
// kernel: tpu_custom_call.1
= control target key start
LH: loop header
LB: loop body
LE: loop exit
PB: predicated region body
PF: predicated region fallthrough
CT: control target
= control target key end

     0   :  { %8 = vsyncpa [#allocation3], 0  ;;  %s295_s0 = inlined_call_operand.hbm [shape: bf16[32,32], index: 0, kind: input, shape index: {}]   ;;  %s296_s1 = inlined_call_operand.hbm [shape: bf16[32,96], index: 1, kind: input, shape index: {}]   ;;  %s297_s2 = inlined_call_operand.vmem [shape: f32[1,96], index: 2, kind: input, shape index: {}]   ;;  %s298_s3 = inlined_call_operand.hbm [shape: bf16[32,96], index: 3, kind: output, shape index: {}]  }
   0x1   :  { %9 = vsyncpa [#allocation6], 0 }
   0x2   :  { %10 = vsyncpa [#allocation4], 0  ;;  %s15_s14 = sshll.u32 %s295_s0, 4  ;;  %s245_s15 = smov [#allocation2]   ;;  %s16_s14 = int_to_ptr.hbm [resolvable:$true] %s15_s14 }
   0x3   :  { %s17_s16 = sshll.u32 %s245_s15, 4  ;;  %s28_s19 = sshll.u32 %s296_s1, 4  ;;  %s18_s16 = int_to_ptr.vmem [resolvable:$true] %s17_s16  ;;  %s29_s19 = int_to_ptr.hbm [resolvable:$true] %s28_s19 }
   0x4   :  { %s246_s20 = smov 64   ;;  %s247_s21 = smov 4  }
   0x5   :  { %23 = dma.hbm_to_vmem [thread:$0]  %s16_s14, 256, %s18_s16, [#allocation3], %s246_s20, %s246_s20, %s247_s21  }
   0x6   :  { %s248_s22 = smov [#allocation5]  }
   0x7   :  { %s30_s23 = sshll.u32 %s248_s22, 4  ;;  %s31_s23 = int_to_ptr.vmem [resolvable:$true] %s30_s23 }
   0x8   :  { %36 = dma.hbm_to_vmem [thread:$0]  %s29_s19, 256, %s31_s23, [#allocation6], %s246_s20, %s246_s20, %s247_s21  }
   0x9   :  { %239 = dma.done.wait [#allocation3], 256  }
   0xa   :  { %240 = vsyncadd [#allocation3], 4294967040 }
   0xb   :  { %241 = dma.done.wait [#allocation6], 256  }
   0xc   :  { %242 = vsyncadd [#allocation6], 4294967040  ;;  %v158_v0 = vld [vmem:[#allocation5 + $0x8] sm:$0xff]  ;;  %v157_v1 = vld [vmem:[#allocation5] sm:$0xff]  ;;  %vm82_vm0 = vcmask 261120   ;;  %vm112_vm1 = vcmask 781312  }
   0xd   :  { %95 = vmatpush.bf16.msra.mxu0 %v158_v0  ;;  %159 = vmatpush.bf16.msra.mxu1 %v158_v0  ;;  %v155_v2 = vld [vmem:[#allocation2] sm:$0xff]  ;;  %v156_v3 = vld [vmem:[#allocation2 + $0x8] sm:$0xff]  ;;  %s249_s24 = smov [#allocation7]  }
   0xe   :  { %v166_v4 = vld [vmem:[%s297_s2] ss:$0 sm:$0xff]  ;;  %s121_s25 = sshll.u32 %s249_s24, 4  ;;  %s123_s2 = sshll.u32 %s298_s3, 4  ;;  %s122_s25 = int_to_ptr.vmem [resolvable:$true] %s121_s25  ;;  %s124_s2 = int_to_ptr.hbm [resolvable:$true] %s123_s2 }
  0x11   :  { %96 = vmatpush.bf16.msra.mxu0 %v157_v1  ;;  %160 = vmatpush.bf16.msra.mxu1 %v157_v1 }
  0x14   :  { %153 = vmatmul.msk.bf16.vlgmr.msra.gmra.mxu0 %vm82_vm0, %v155_v2  ;;  %154 = vmatmul.msk.bf16.vlgmr.msra.gmra.mxu1 %vm82_vm0, %v156_v3 }
  0x91   :  { %v98_v5 = vpop.f32.mrf.mxu0  ;;  %v103_v6 = vpop.f32.mrf.mxu1 }
  0x92   :  { %v99_v7 = vadd.f32 %v166_v4, %v98_v5  ;;  %v104_v8 = vadd.f32 %v166_v4, %v103_v6 }
  0x94   :  { %v108_v9 = vpack.c.bf16 %v99_v7, %v99_v7  ;;  %v110_v10 = vpack.c.bf16 %v104_v8, %v104_v8 }
  0x96   :  { %113 = vst.msk [vmem:[#allocation7] sm:$0xf] %vm112_vm1, %v108_v9 }
  0x97   :  { %115 = vst.msk [vmem:[#allocation7 + $0x8] sm:$0xf] %vm112_vm1, %v110_v10 }
  0x99   :  { %v100_v11 = vpop.f32.mrf.mxu0  ;;  %v105_v12 = vpop.f32.mrf.mxu1 }
  0x9a   :  { %v101_v13 = vadd.f32 %v166_v4, %v100_v11  ;;  %v106_v14 = vadd.f32 %v166_v4, %v105_v12 }
  0x9c   :  { %v109_v15 = vpack.c.bf16 %v101_v13, %v101_v13  ;;  %v111_v16 = vpack.c.bf16 %v106_v14, %v106_v14 }
  0x9e   :  { %114 = vst.msk [vmem:[#allocation7 + $0x4] sm:$0xf] %vm112_vm1, %v109_v15 }
  0x9f   :  { %116 = vst.msk [vmem:[#allocation7 + $0xc] sm:$0xf] %vm112_vm1, %v111_v16 }
  0xa0   :  { %129 = dma.vmem_to_hbm [thread:$0]  %s122_s25, 256, %s124_s2, [#allocation4], %s246_s20, %s246_s20, %s247_s21  }
  0xa1   :  { %243 = dma.done.wait [#allocation4], 256  }
  0xa2   :  { %244 = vsyncadd [#allocation4], 4294967040 }
  0xa3   :  { %134 = vsyncpa [#allocation3], 1 }
  0xa4   :  { %135 = vsyncpa [#allocation6], 1 }
  0xa5   :  { %136 = vsyncpa [#allocation4], 1 }

</bundles_post_ra>
